<compile_context>
chip_gen: v7x
topology: tpu7x:2x2x1
jax: 0.10.0
libtpu: 0.0.40
codegen_flags: <defaults>
</compile_context>

<pallas_src>
import functools

import jax
import jax.numpy as jnp
from jax import lax
from jax.experimental import pallas as pl
from jax.experimental.pallas import tpu as pltpu

_PROJ = 64          # query/key projection width (fixed by the module)
_LANE = 128         # lane tile width
_SUBLANE = 8        # sublane tile height
_TEMPERATURE = 8.0  # fixed attention temperature from the module


def _round_up(x, m):
    return ((x + m - 1) // m) * m


def _packed_offsets(latent_dim, hidden_dim):
    """Column offsets (128-lane aligned) of each logical block in the packed
    parameter slab, plus bias-row index and total rows/cols."""
    assert latent_dim % _SUBLANE == 0, "latent_dim must be a multiple of 8"
    assert hidden_dim % _SUBLANE == 0, "hidden_dim must be a multiple of 8"
    L, H = latent_dim, hidden_dim
    q_off = 0                                    # wq * (1/T), zero-padded to 128 lanes
    k_off = q_off + _LANE                        # wk, zero-padded to 128 lanes
    t1_off = k_off + _LANE                       # wt1 [2L, H]
    t2_off = t1_off + _round_up(H, _LANE)        # wt2 [H, L]
    p_off = t2_off + _round_up(L, _LANE)         # wp  [2L, L]
    total = p_off + _round_up(L, _LANE)
    w_rows = _round_up(max(2 * L, H), _SUBLANE)  # weight rows
    bias_row = w_rows                            # all biases live in this row
    rows = w_rows + _SUBLANE                     # pad bias block to a full sublane tile
    return dict(q=q_off, k=k_off, t1=t1_off, t2=t2_off, p=p_off,
                total=total, bias_row=bias_row, rows=rows)


def _out_layout(latent_dim, num_examples):
    """Lane layout of the packed output slab: pred in [0:L), attn in
    [attn_off:attn_off+N); padded up to a lane-dense multiple of 128."""
    attn_off = _round_up(latent_dim, _PROJ)            # 64-aligned, >= L
    out_w = _round_up(attn_off + num_examples, _LANE)  # lane-dense width
    return attn_off, out_w


def _attention_solver_kernel(act_ref, w_ref, out_ref, *,
                             L, H, B, N, Bp, Np,
                             q_off, k_off, t1_off, t2_off, p_off,
                             bias_row, attn_off):
    f32 = jnp.float32
    br = bias_row

    # ---- stacked activations (row segments are 8-sublane aligned) ----------
    test = act_ref[0:B, :]                        # [B, L]
    tin = act_ref[Bp:Bp + N, :]                   # [N, L]
    tout = act_ref[Bp + Np:Bp + Np + N, :]        # [N, L]
    tin0 = act_ref[Bp:Bp + 1, :]                  # [1, L]
    tout0 = act_ref[Bp + Np:Bp + Np + 1, :]       # [1, L]

    # ---- transformation inference (split-accumulate; no lane concat) -------
    h = (jnp.dot(tin0, w_ref[0:L, t1_off:t1_off + H],
                 preferred_element_type=f32)
         + jnp.dot(tout0, w_ref[L:2 * L, t1_off:t1_off + H],
                   preferred_element_type=f32)
         + w_ref[br:br + 1, t1_off:t1_off + H])                       # [1, H]
    h = jnp.maximum(h, 0.0)                                           # ReLU
    transformation = (jnp.dot(h, w_ref[0:H, t2_off:t2_off + L],
                              preferred_element_type=f32)
                      + w_ref[br:br + 1, t2_off:t2_off + L])          # [1, L]

    # ---- prediction module (split-accumulate; no lane concat) --------------
    transformed = test + transformation                               # [B, L]
    pred = (jnp.dot(test, w_ref[0:L, p_off:p_off + L],
                    preferred_element_type=f32)
            + jnp.dot(transformed, w_ref[L:2 * L, p_off:p_off + L],
                      preferred_element_type=f32)
            + w_ref[br:br + 1, p_off:p_off + L])                      # [B, L]

    # ---- attention mechanism ------------------------------------------------
    # q/k blocks are 128-lane aligned and zero-padded in lanes 64:128, so we
    # keep the full 128-lane width (no mid-tile slicing) and contract over all
    # 128 lanes: the padding contributes exactly zero to the scores.
    q = (jnp.dot(test, w_ref[0:L, q_off:q_off + _LANE],
                 preferred_element_type=f32)
         + w_ref[br:br + 1, q_off:q_off + _LANE])                     # [B, 128]
    k = (jnp.dot(tin, w_ref[0:L, k_off:k_off + _LANE],
                 preferred_element_type=f32)
         + w_ref[br:br + 1, k_off:k_off + _LANE])                     # [N, 128]

    # Contraction over the last dim of both operands (flash-attention style
    # q·kᵀ); Mosaic lowers this directly to the MXU without an explicit
    # transpose of k.
    scores = lax.dot_general(q, k, (((1,), (1,)), ((), ())),
                             preferred_element_type=f32)              # [B, N]
    m = jnp.max(scores, axis=-1, keepdims=True)
    e = jnp.exp(scores - m)
    attn = e * pl.reciprocal(jnp.sum(e, axis=-1, keepdims=True), approx=True)

    weighted = jnp.dot(attn, tout, preferred_element_type=f32)        # [B, L]

    # ---- single lane-dense output slab (one dense output DMA) --------------
    out_ref[:, 0:L] = (pred + weighted).astype(out_ref.dtype)
    out_ref[:, attn_off:attn_off + N] = attn.astype(out_ref.dtype)
    # Lanes outside the two written ranges are never read by the wrapper.


@functools.partial(jax.jit, static_argnames=("hidden_dim",))
def attention_solver_forward(test_latent, train_input_latents,
                             train_output_latents, w_packed, *, hidden_dim):
    """Pallas implementation of AttentionSolver.forward.

    Assumes train_input_latents.shape[0] > 0.
    # TODO(synk): empty-train-set branch (num_examples == 0) not lowered to
    # Pallas; it is a static shape check in PyTorch — guard in plain JAX.
    """
    B, L = test_latent.shape
    N = train_input_latents.shape[0]
    off = _packed_offsets(L, hidden_dim)
    attn_off, out_w = _out_layout(L, N)

    # Pre-stack activations into one array (row segments sublane-aligned) so
    # the kernel sees exactly two input DMAs: activations + parameter slab.
    Bp = _round_up(B, _SUBLANE)
    Np = _round_up(N, _SUBLANE)

    def pad_rows(x, rows):
        extra = rows - x.shape[0]
        if extra == 0:
            return x
        return jnp.concatenate(
            [x, jnp.zeros((extra, x.shape[1]), x.dtype)], axis=0)

    act = jnp.concatenate(
        [pad_rows(test_latent.astype(jnp.float32), Bp),
         pad_rows(train_input_latents.astype(jnp.float32), Np),
         pad_rows(train_output_latents.astype(jnp.float32), Np)],
        axis=0)                                                   # [Bp+2Np, L]

    kernel = functools.partial(
        _attention_solver_kernel,
        L=L, H=hidden_dim, B=B, N=N, Bp=Bp, Np=Np,
        q_off=off["q"], k_off=off["k"], t1_off=off["t1"],
        t2_off=off["t2"], p_off=off["p"],
        bias_row=off["bias_row"], attn_off=attn_off)

    vmem = pl.BlockSpec(memory_space=pltpu.MemorySpace.VMEM)
    out = pl.pallas_call(
        kernel,
        out_shape=jax.ShapeDtypeStruct((B, out_w), jnp.float32),
        in_specs=[vmem, vmem],
        out_specs=vmem,
    )(act, w_packed)

    predicted_latent = out[:, 0:L]
    attention_weights = out[:, attn_off:attn_off + N]
    return predicted_latent, attention_weights


def init_params(key, latent_dim, hidden_dim=64):
    """Deterministic synthetic parameters (nn.Linear shapes stored as [in, out])."""
    ks = jax.random.split(key, 5)
    s = 0.1

    def lin(k, fan_in, fan_out):
        kw, kb = jax.random.split(k)
        w = s * jax.random.normal(kw, (fan_in, fan_out), jnp.float32)
        b = s * jax.random.normal(kb, (fan_out,), jnp.float32)
        return w, b

    wq, bq = lin(ks[0], latent_dim, _PROJ)
    wk, bk = lin(ks[1], latent_dim, _PROJ)
    wt1, bt1 = lin(ks[2], 2 * latent_dim, hidden_dim)
    wt2, bt2 = lin(ks[3], hidden_dim, latent_dim)
    wp, bp = lin(ks[4], 2 * latent_dim, latent_dim)

    return {"wq": wq, "bq": bq, "wk": wk, "bk": bk,
            "wt1": wt1, "bt1": bt1, "wt2": wt2, "bt2": bt2,
            "wp": wp, "bp": bp}


def pack_params(p, latent_dim, hidden_dim):
    """One-time packing of all weights AND biases into a single f32 slab.

    Column blocks are 128-lane aligned; biases live in one padded sublane-tile
    of rows after the weights; the 1/temperature attention scale is folded
    into the query block.
    """
    off = _packed_offsets(latent_dim, hidden_dim)
    L, H = latent_dim, hidden_dim
    scale = 1.0 / _TEMPERATURE
    br = off["bias_row"]

    w = jnp.zeros((off["rows"], off["total"]), jnp.float32)

    # query / key blocks (each 128-lane aligned, zero-padded in lanes 64:128)
    w = w.at[0:L, off["q"]:off["q"] + _PROJ].set(p["wq"] * scale)
    w = w.at[br, off["q"]:off["q"] + _PROJ].set(p["bq"] * scale)
    w = w.at[0:L, off["k"]:off["k"] + _PROJ].set(p["wk"])
    w = w.at[br, off["k"]:off["k"] + _PROJ].set(p["bk"])

    # transformation inference
    w = w.at[0:2 * L, off["t1"]:off["t1"] + H].set(p["wt1"])
    w = w.at[br, off["t1"]:off["t1"] + H].set(p["bt1"])
    w = w.at[0:H, off["t2"]:off["t2"] + L].set(p["wt2"])
    w = w.at[br, off["t2"]:off["t2"] + L].set(p["bt2"])

    # prediction module
    w = w.at[0:2 * L, off["p"]:off["p"] + L].set(p["wp"])
    w = w.at[br, off["p"]:off["p"] + L].set(p["bp"])
    return w


def reference_forward(test_latent, tin, tout, p):
    """Pure-JAX reference mirroring the PyTorch module (unpacked params)."""
    pair = jnp.concatenate([tin[0:1], tout[0:1]], axis=-1)
    h = jax.nn.relu(pair @ p["wt1"] + p["bt1"])
    transformation = h @ p["wt2"] + p["bt2"]
    transformed = test_latent + transformation
    combined = jnp.concatenate([test_latent, transformed], axis=-1)
    pred = combined @ p["wp"] + p["bp"]
    q = test_latent @ p["wq"] + p["bq"]
    k = tin @ p["wk"] + p["bk"]
    scores = q @ k.T / _TEMPERATURE
    attn = jax.nn.softmax(scores, axis=1)
    pred = pred + attn @ tout
    return pred, attn


if __name__ == "__main__":
    latent_dim = 32
    hidden_dim = 64
    batch_size = 8
    num_examples = 8

    key = jax.random.PRNGKey(0)
    k_params, k_test, k_tin, k_tout = jax.random.split(key, 4)

    params = init_params(k_params, latent_dim, hidden_dim)
    w_packed = pack_params(params, latent_dim, hidden_dim)

    test_latent = jax.random.normal(k_test, (batch_size, latent_dim), jnp.float32)
    train_in = jax.random.normal(k_tin, (num_examples, latent_dim), jnp.float32)
    train_out = jax.random.normal(k_tout, (num_examples, latent_dim), jnp.float32)

    pred, attn = attention_solver_forward(
        test_latent, train_in, train_out, w_packed, hidden_dim=hidden_dim)
    pred = jax.block_until_ready(pred)
    attn = jax.block_until_ready(attn)

    # sanity check against pure-JAX reference (tolerances loosened slightly for
    # the approx-EUP softmax reciprocal)
    pred_ref, attn_ref = reference_forward(test_latent, train_in, train_out, params)
    assert pred.shape == (batch_size, latent_dim)
    assert attn.shape == (batch_size, num_examples)
    assert jnp.allclose(pred, pred_ref, atol=2e-3, rtol=2e-3)
    assert jnp.allclose(attn, attn_ref, atol=1e-3, rtol=1e-3)

    print("KERNEL_OK")
</pallas_src>

<mosaic_0001>
module attributes {stable_mosaic.version = 11 : i64} {
  func.func @_attention_solver_kernel(%arg0: memref<24x32xf32, #tpu.memory_space<vmem>>, %arg1: memref<72x640xf32, #tpu.memory_space<vmem>>, %arg2: memref<8x128xf32, #tpu.memory_space<vmem>>) attributes {dimension_semantics = [], scalar_prefetch = 0 : i64, scratch_operands = 0 : i64, tpu.core_type = #tpu.core_type<tc>} {
    %c0 = arith.constant 0 : index
    %c0_0 = arith.constant 0 : index
    %0 = vector.load %arg0[%c0, %c0_0] : memref<24x32xf32, #tpu.memory_space<vmem>>, vector<8x32xf32>
    %c8 = arith.constant 8 : index
    %c0_1 = arith.constant 0 : index
    %1 = vector.load %arg0[%c8, %c0_1] : memref<24x32xf32, #tpu.memory_space<vmem>>, vector<8x32xf32>
    %c16 = arith.constant 16 : index
    %c0_2 = arith.constant 0 : index
    %2 = vector.load %arg0[%c16, %c0_2] : memref<24x32xf32, #tpu.memory_space<vmem>>, vector<8x32xf32>
    %c8_3 = arith.constant 8 : index
    %c0_4 = arith.constant 0 : index
    %3 = vector.load %arg0[%c8_3, %c0_4] : memref<24x32xf32, #tpu.memory_space<vmem>>, vector<1x32xf32>
    %c16_5 = arith.constant 16 : index
    %c0_6 = arith.constant 0 : index
    %4 = vector.load %arg0[%c16_5, %c0_6] : memref<24x32xf32, #tpu.memory_space<vmem>>, vector<1x32xf32>
    %c0_7 = arith.constant 0 : index
    %c256 = arith.constant 256 : index
    %5 = vector.load %arg1[%c0_7, %c256] : memref<72x640xf32, #tpu.memory_space<vmem>>, vector<32x64xf32>
    %cst = arith.constant dense<0.000000e+00> : vector<1x64xf32>
    %6 = tpu.matmul %3, %5, %cst {dimension_numbers = #tpu.dot_dimension_numbers<[1], [0], [0], [1], [0, 0, 1, 1], [], []>} : vector<1x32xf32>, vector<32x64xf32>, vector<1x64xf32> -> vector<1x64xf32>
    %c32 = arith.constant 32 : index
    %c256_8 = arith.constant 256 : index
    %7 = vector.load %arg1[%c32, %c256_8] : memref<72x640xf32, #tpu.memory_space<vmem>>, vector<32x64xf32>
    %cst_9 = arith.constant dense<0.000000e+00> : vector<1x64xf32>
    %8 = tpu.matmul %4, %7, %cst_9 {dimension_numbers = #tpu.dot_dimension_numbers<[1], [0], [0], [1], [0, 0, 1, 1], [], []>} : vector<1x32xf32>, vector<32x64xf32>, vector<1x64xf32> -> vector<1x64xf32>
    %9 = arith.addf %6, %8 : vector<1x64xf32>
    %c64 = arith.constant 64 : index
    %c256_10 = arith.constant 256 : index
    %10 = vector.load %arg1[%c64, %c256_10] : memref<72x640xf32, #tpu.memory_space<vmem>>, vector<1x64xf32>
    %11 = arith.addf %9, %10 : vector<1x64xf32>
    %cst_11 = arith.constant 0.000000e+00 : f32
    %12 = vector.broadcast %cst_11 : f32 to vector<1x64xf32>
    %13 = arith.maximumf %11, %12 : vector<1x64xf32>
    %c0_12 = arith.constant 0 : index
    %c384 = arith.constant 384 : index
    %14 = vector.load %arg1[%c0_12, %c384] : memref<72x640xf32, #tpu.memory_space<vmem>>, vector<64x32xf32>
    %cst_13 = arith.constant dense<0.000000e+00> : vector<1x32xf32>
    %15 = tpu.matmul %13, %14, %cst_13 {dimension_numbers = #tpu.dot_dimension_numbers<[1], [0], [0], [1], [0, 0, 1, 1], [], []>} : vector<1x64xf32>, vector<64x32xf32>, vector<1x32xf32> -> vector<1x32xf32>
    %c64_14 = arith.constant 64 : index
    %c384_15 = arith.constant 384 : index
    %16 = vector.load %arg1[%c64_14, %c384_15] : memref<72x640xf32, #tpu.memory_space<vmem>>, vector<1x32xf32>
    %17 = arith.addf %15, %16 : vector<1x32xf32>
    %18 = vector.broadcast %17 : vector<1x32xf32> to vector<8x32xf32>
    %19 = arith.addf %0, %18 : vector<8x32xf32>
    %c0_16 = arith.constant 0 : index
    %c512 = arith.constant 512 : index
    %20 = vector.load %arg1[%c0_16, %c512] : memref<72x640xf32, #tpu.memory_space<vmem>>, vector<32x32xf32>
    %cst_17 = arith.constant dense<0.000000e+00> : vector<8x32xf32>
    %21 = tpu.matmul %0, %20, %cst_17 {dimension_numbers = #tpu.dot_dimension_numbers<[1], [0], [0], [1], [0, 0, 1, 1], [], []>} : vector<8x32xf32>, vector<32x32xf32>, vector<8x32xf32> -> vector<8x32xf32>
    %c32_18 = arith.constant 32 : index
    %c512_19 = arith.constant 512 : index
    %22 = vector.load %arg1[%c32_18, %c512_19] : memref<72x640xf32, #tpu.memory_space<vmem>>, vector<32x32xf32>
    %cst_20 = arith.constant dense<0.000000e+00> : vector<8x32xf32>
    %23 = tpu.matmul %19, %22, %cst_20 {dimension_numbers = #tpu.dot_dimension_numbers<[1], [0], [0], [1], [0, 0, 1, 1], [], []>} : vector<8x32xf32>, vector<32x32xf32>, vector<8x32xf32> -> vector<8x32xf32>
    %24 = arith.addf %21, %23 : vector<8x32xf32>
    %c64_21 = arith.constant 64 : index
    %c512_22 = arith.constant 512 : index
    %25 = vector.load %arg1[%c64_21, %c512_22] : memref<72x640xf32, #tpu.memory_space<vmem>>, vector<1x32xf32>
    %26 = vector.broadcast %25 : vector<1x32xf32> to vector<8x32xf32>
    %27 = arith.addf %24, %26 : vector<8x32xf32>
    %c0_23 = arith.constant 0 : index
    %c0_24 = arith.constant 0 : index
    %28 = vector.load %arg1[%c0_23, %c0_24] : memref<72x640xf32, #tpu.memory_space<vmem>>, vector<32x128xf32>
    %cst_25 = arith.constant dense<0.000000e+00> : vector<8x128xf32>
    %29 = tpu.matmul %0, %28, %cst_25 {dimension_numbers = #tpu.dot_dimension_numbers<[1], [0], [0], [1], [0, 0, 1, 1], [], []>} : vector<8x32xf32>, vector<32x128xf32>, vector<8x128xf32> -> vector<8x128xf32>
    %c64_26 = arith.constant 64 : index
    %c0_27 = arith.constant 0 : index
    %30 = vector.load %arg1[%c64_26, %c0_27] : memref<72x640xf32, #tpu.memory_space<vmem>>, vector<1x128xf32>
    %31 = vector.broadcast %30 : vector<1x128xf32> to vector<8x128xf32>
    %32 = arith.addf %29, %31 : vector<8x128xf32>
    %c0_28 = arith.constant 0 : index
    %c128 = arith.constant 128 : index
    %33 = vector.load %arg1[%c0_28, %c128] : memref<72x640xf32, #tpu.memory_space<vmem>>, vector<32x128xf32>
    %cst_29 = arith.constant dense<0.000000e+00> : vector<8x128xf32>
    %34 = tpu.matmul %1, %33, %cst_29 {dimension_numbers = #tpu.dot_dimension_numbers<[1], [0], [0], [1], [0, 0, 1, 1], [], []>} : vector<8x32xf32>, vector<32x128xf32>, vector<8x128xf32> -> vector<8x128xf32>
    %c64_30 = arith.constant 64 : index
    %c128_31 = arith.constant 128 : index
    %35 = vector.load %arg1[%c64_30, %c128_31] : memref<72x640xf32, #tpu.memory_space<vmem>>, vector<1x128xf32>
    %36 = vector.broadcast %35 : vector<1x128xf32> to vector<8x128xf32>
    %37 = arith.addf %34, %36 : vector<8x128xf32>
    %cst_32 = arith.constant dense<0.000000e+00> : vector<8x8xf32>
    %38 = tpu.matmul %32, %37, %cst_32 {dimension_numbers = #tpu.dot_dimension_numbers<[1], [1], [0], [0], [0, 0, 1, 0], [], []>} : vector<8x128xf32>, vector<8x128xf32>, vector<8x8xf32> -> vector<8x8xf32>
    %cst_33 = arith.constant dense<0xFF800000> : vector<8xf32>
    %39 = vector.multi_reduction <maximumf>, %38, %cst_33 [1] : vector<8x8xf32> to vector<8xf32>
    %40 = vector.shape_cast %39 : vector<8xf32> to vector<8x1xf32>
    %41 = vector.broadcast %40 : vector<8x1xf32> to vector<8x8xf32>
    %42 = arith.subf %38, %41 : vector<8x8xf32>
    %43 = math.exp %42 : vector<8x8xf32>
    %cst_34 = arith.constant dense<0.000000e+00> : vector<8xf32>
    %44 = vector.multi_reduction <add>, %43, %cst_34 [1] : vector<8x8xf32> to vector<8xf32>
    %45 = vector.shape_cast %44 : vector<8xf32> to vector<8x1xf32>
    %46 = tpu.reciprocal %45 {approx = true} : vector<8x1xf32> -> vector<8x1xf32>
    %47 = vector.broadcast %46 : vector<8x1xf32> to vector<8x8xf32>
    %48 = arith.mulf %43, %47 : vector<8x8xf32>
    %cst_35 = arith.constant dense<0.000000e+00> : vector<8x32xf32>
    %49 = tpu.matmul %48, %2, %cst_35 {dimension_numbers = #tpu.dot_dimension_numbers<[1], [0], [0], [1], [0, 0, 1, 1], [], []>} : vector<8x8xf32>, vector<8x32xf32>, vector<8x32xf32> -> vector<8x32xf32>
    %50 = arith.addf %27, %49 : vector<8x32xf32>
    %c0_36 = arith.constant 0 : index
    %c0_37 = arith.constant 0 : index
    %51 = vector.load %arg2[%c0_36, %c0_37] : memref<8x128xf32, #tpu.memory_space<vmem>>, vector<8x32xf32>
    tpu.vector_store %arg2[%c0_36, %c0_37], %50 {strides = array<i32>} : memref<8x128xf32, #tpu.memory_space<vmem>>, vector<8x32xf32>,
    %c0_38 = arith.constant 0 : index
    %c64_39 = arith.constant 64 : index
    %52 = vector.load %arg2[%c0_38, %c64_39] : memref<8x128xf32, #tpu.memory_space<vmem>>, vector<8x8xf32>
    tpu.vector_store %arg2[%c0_38, %c64_39], %48 {strides = array<i32>} : memref<8x128xf32, #tpu.memory_space<vmem>>, vector<8x8xf32>,
    return
  }
}

</mosaic_0001>

<bundles_post_ra>
// kernel: attention_solver_forward.1
= control target key start
LH: loop header
LB: loop body
LE: loop exit
PB: predicated region body
PF: predicated region fallthrough
CT: control target
= control target key end

     0   :  { %7 = vsyncpa [#allocation3], 0  ;;  %s986_s9 = smov [#allocation2]   ;;  %s1087_s0 = inlined_call_operand.vmem [shape: f32[24,32], index: 0, kind: input, shape index: {}]   ;;  %s1088_s1 = inlined_call_operand.hbm [shape: f32[72,640], index: 1, kind: input, shape index: {}]   ;;  %s1089_s2 = inlined_call_operand.vmem [shape: f32[8,128], index: 2, kind: output, shape index: {}]  }
   0x1   :  { %s15_s10 = sshll.u32 %s986_s9, 4  ;;  %s962_s13 = scalar_lea.hbm %s1088_s1, 5760  ;;  %s16_s10 = int_to_ptr.vmem [resolvable:$true] %s15_s10 }
   0x2   :  { %p963_p0 = scmp.ne.s32.totalorder %s1088_s1, %s962_s13  ;;  %p966_p1 = scmp.lt.u32.totalorder %s962_s13, %s1088_s1 }
   0x4   :  { %p968_p2 = pnand %p966_p1, %p963_p0 }
   0x6   :  { %971 = shalt.err (!%p968_p2)
}
   0x7   :  { %s972_s18 = scalar_lea.vmem %s16_s10, 5760  ;;  %p977_p4 = scmp.lt.s32.totalorder %s16_s10, %s16_s10 }
   0x8   :  { %p973_p3 = scmp.ne.s32.totalorder %s16_s10, %s972_s18  ;;  %p978_p5 = scmp.lt.s32.totalorder %s972_s18, %s972_s18 }
   0xa   :  { %p979_p6 = por %p978_p5, %p977_p4 }
   0xc   :  { %p980_p7 = pnand %p979_p6, %p973_p3 }
   0xe   :  { %983 = shalt.err (!%p980_p7)
}
   0xf   :  { %s987_s19 = smov 640   ;;  %s988_s20 = smov 40  }
  0x10   :  { %21 = dma.hbm_to_vmem [thread:$0]  %s1088_s1, 5760, %s16_s10, [#allocation3], %s987_s19, %s987_s19, %s988_s20  }
  0x11   :  { %984 = dma.done.wait [#allocation3], 5760  }
  0x12   :  { %985 = vsyncadd [#allocation3], 4294961536  ;;  %v989_v0 = vmov 0.0|0.0   ;;  %vm990_vm0 = vmmov 0   ;;  %v991_v1 = vmov 0.0   ;;  %v34_v2 = vld [vmem:[#allocation2 + $0xb0] sm:$0xff]  ;;  %v271_v49 = vlaneseq }
  0x13   :  { %898 = vmatprep.subr.bf16.mxu0 %v989_v0  ;;  %904 = vmatprep.subr.bf16.mxu1 %v989_v0  ;;  %v35_v3 = vld [vmem:[#allocation2 + $0xd8] sm:$0xff]  ;;  %v30_v4 = vld [vmem:[#allocation2 + $0x10] sm:$0xff]  ;;  %v36_v7 = vld [vmem:[#allocation2 + $0x100] sm:$0xff]  ;;  %vm38_vm1 = vcmask 261120   ;;  %vm197_vm2 = vcmask 523264   ;;  %vm655_vm3 = vcmask 64512  }
  0x14   :  { %811 = vmatprep.mubr.msk.f32.mxu0 %vm990_vm0, %v991_v1  ;;  %822 = vmatprep.mubr.msk.f32.mxu1 %vm990_vm0, %v991_v1  ;;  %v899_v5 = vpack.c.bf16 %v35_v3, %v34_v2  ;;  %v31_v6 = vld [vmem:[#allocation2 + $0x38] sm:$0xff]  ;;  %v37_v8 = vld [vmem:[#allocation2 + $0x128] sm:$0xff]  ;;  %v32_v10 = vld [vmem:[#allocation2 + $0x60] sm:$0xff]  ;;  %v272_v50 = vshrl.u32 %v271_v49, 7  ;;  %s992_s4 = smov 64   ;;  %vm745_vm4 = vcmask 589312  }
  0x15   :  { %v905_v9 = vpack.c.bf16 %v31_v6, %v30_v4  ;;  %v33_v11 = vld [vmem:[#allocation2 + $0x88] sm:$0xff]  ;;  %v902_v12 = vpack.c.bf16 %v37_v8, %v36_v7  ;;  %v188_v14 = vld [vmem:[#allocation2 + $0x18] sm:$0xff]  ;;  %v189_v15 = vld [vmem:[#allocation2 + $0x40] sm:$0xff] }
  0x16   :  { %900 = vmatpush3.bf16.msra.mxu0 %v899_v5  ;;  %v908_v13 = vpack.c.bf16 %v33_v11, %v32_v10  ;;  %v29_v16 = vld [vmem:[%s1087_s0 + $0x10] sm:$0x1]  ;;  %v911_v17 = vpack.c.bf16 %v189_v15, %v188_v14  ;;  %v28_v18 = vld [vmem:[%s1087_s0 + $0x8] sm:$0x1]  ;;  %v192_v22 = vld [vmem:[#allocation2 + $0xb8] sm:$0xff]  ;;  %v273_v52 = vsub.s32 0, %v272_v50 }
  0x17   :  { %906 = vmatpush3.bf16.msra.mxu1 %v905_v9  ;;  %901 = vmatprep.subr.bf16.mxu0 %v989_v0  ;;  %v190_v19 = vld [vmem:[#allocation2 + $0x68] sm:$0xff]  ;;  %v191_v20 = vld [vmem:[#allocation2 + $0x90] sm:$0xff]  ;;  %v193_v23 = vld [vmem:[#allocation2 + $0xe0] sm:$0xff] }
  0x18   :  { %907 = vmatprep.subr.bf16.mxu1 %v989_v0  ;;  %v914_v21 = vpack.c.bf16 %v191_v20, %v190_v19  ;;  %v917_v24 = vpack.c.bf16 %v193_v23, %v192_v22  ;;  %v194_v25 = vld [vmem:[#allocation2 + $0x108] sm:$0xff]  ;;  %v195_v26 = vld [vmem:[#allocation2 + $0x130] sm:$0xff]  ;;  %v280_v28 = vld [vmem:[#allocation2 + $0xc0] sm:$0xff] }
  0x19   :  { %v920_v27 = vpack.c.bf16 %v195_v26, %v194_v25  ;;  %v281_v29 = vld [vmem:[#allocation2 + $0xe8] sm:$0xff]  ;;  %v185_v33 = vld [vmem:[#allocation2 + $0x150] ss:$0 sm:$0xff]  ;;  %v283_v40 = vld [vmem:[#allocation2 + $0x138] sm:$0xff] }
  0x1a   :  { %903 = vmatpush3.bf16.msra.mxu0 %v902_v12  ;;  %v923_v30 = vpack.c.bf16 %v281_v29, %v280_v28  ;;  %v282_v39 = vld [vmem:[#allocation2 + $0x110] sm:$0xff]  ;;  %v432_v42 = vld [vmem:[#allocation2] sm:$0xff]  ;;  %v433_v43 = vld [vmem:[#allocation2 + $0x28] sm:$0xff] }
  0x1b   :  { %909 = vmatpush3.bf16.msra.mxu1 %v908_v13  ;;  %910 = vmatprep.subr.bf16.mxu0 %v989_v0  ;;  %v926_v41 = vpack.c.bf16 %v283_v40, %v282_v39  ;;  %v935_v44 = vpack.c.bf16 %v433_v43, %v432_v42  ;;  %v434_v45 = vld [vmem:[#allocation2 + $0x50] sm:$0xff]  ;;  %v435_v46 = vld [vmem:[#allocation2 + $0x78] sm:$0xff]  ;;  %v25_v48 = vld [vmem:[%s1087_s0] sm:$0xff] }
  0x1c   :  { %922 = vmatprep.subr.bf16.mxu1 %v989_v0  ;;  %v938_v47 = vpack.c.bf16 %v435_v46, %v434_v45  ;;  %v196_v51 = vld [vmem:[#allocation2 + $0x158] ss:$0 sm:$0xff]  ;;  %v276_v56 = vld [vmem:[#allocation2 + $0x20] sm:$0xff]  ;;  %v277_v57 = vld [vmem:[#allocation2 + $0x48] sm:$0xff] }
  0x1d   :  { %812 = vmatmul.mubr.msk.f32.vlgmr.msra.gmra.mrb[0].mxu0 %vm38_vm1, %v29_v16  ;;  %v929_v59 = vpack.c.bf16 %v277_v57, %v276_v56  ;;  %v278_v61 = vld [vmem:[#allocation2 + $0x70] sm:$0xff]  ;;  %v279_v62 = vld [vmem:[#allocation2 + $0x98] sm:$0xff]  ;;  %v507_v2 = vld [vmem:[#allocation2 + $0x8] sm:$0xff] }
  0x1e   :  { %823 = vmatmul.mubr.msk.f32.vlgmr.msra.gmra.mrb[0].mxu1 %vm38_vm1, %v28_v18  ;;  %912 = vmatpush3.bf16.msra.mxu0 %v911_v17  ;;  %v932_v63 = vpack.c.bf16 %v279_v62, %v278_v61  ;;  %v508_v3 = vld [vmem:[#allocation2 + $0x30] sm:$0xff]  ;;  %v509_v5 = vld [vmem:[#allocation2 + $0x58] sm:$0xff]  ;;  %v510_v6 = vld [vmem:[#allocation2 + $0x80] sm:$0xff] }
  0x1f   :  { %913 = vmatprep.subr.bf16.mxu0 %v989_v0  ;;  %841 = vmatprep.mubr.msk.f32.mxu0 %vm990_vm0, %v991_v1  ;;  %v941_v4 = vpack.c.bf16 %v508_v3, %v507_v2  ;;  %v944_v7 = vpack.c.bf16 %v510_v6, %v509_v5  ;;  %v26_v8 = vld [vmem:[%s1087_s0 + $0x8] sm:$0xff]  ;;  %v436_v12 = vld [vmem:[#allocation2 + $0x140] ss:$0 sm:$0xff]  ;;  %v27_v23 = vld [vmem:[%s1087_s0 + $0x10] sm:$0xff] }
  0x20   :  { %852 = vmatprep.mubr.msk.f32.mxu1 %vm990_vm0, %v991_v1  ;;  %924 = vmatpush3.bf16.msra.mxu1 %v923_v30  ;;  %v511_v11 = vld [vmem:[#allocation2 + $0x148] ss:$0 sm:$0xff] }
  0x21   :  { %925 = vmatprep.subr.bf16.mxu1 %v989_v0 }
  0x22   :  { %915 = vmatpush3.bf16.msra.mxu0 %v914_v21 }
  0x23   :  { %916 = vmatprep.subr.bf16.mxu0 %v989_v0 }
  0x24   :  { %927 = vmatpush3.bf16.msra.mxu1 %v926_v41 }
  0x25   :  { %928 = vmatprep.subr.bf16.mxu1 %v989_v0 }
  0x26   :  { %918 = vmatpush3.bf16.msra.mxu0 %v917_v24 }
  0x27   :  { %919 = vmatprep.subr.bf16.mxu0 %v989_v0 }
  0x2a   :  { %921 = vmatpush3.bf16.msra.mxu0 %v920_v27  ;;  %v430_v27 = vld [vmem:[#allocation2 + $0x160] ss:$0 sm:$0xff] }
  0x2b   :  { %934 = vmatprep.subr.bf16.mxu0 %v989_v0 }
  0xf0   :  { %v108_v31 = vpop.f32.mrb[0].mxu0 }
  0xf1   :  { %v181_v32 = vpop.f32.mrb[0].mxu1  ;;  %v813_v34 = vpop.f32.mrb[1].mxu0 }
  0xf2   :  { %v182_v35 = vadd.f32 %v181_v32, %v108_v31  ;;  %v824_v36 = vpop.f32.mrb[1].mxu1 }
  0xf4   :  { %v186_v37 = vadd.f32 %v185_v33, %v182_v35 }
  0xf6   :  { %v187_v38 = vmax.f32 %v186_v37, 0.0 }
  0xf8   :  { %842 = vmatmul.mubr.msk.f32.vlgmr.msra.gmra.mrb[2].mxu0 %vm197_vm2, %v187_v38 }
  0xf9   :  { %874 = vmatprep.mubr.msk.f32.mxu0 %vm990_vm0, %v991_v1  ;;  %936 = vmatpush3.bf16.msra.mxu0 %v935_v44 }
  0xfa   :  { %937 = vmatprep.subr.bf16.mxu0 %v989_v0 }
  0xfd   :  { %939 = vmatpush3.bf16.msra.mxu0 %v938_v47 }
  0xfe   :  { %888 = vmatprep.subr.mxu0 %v991_v1 }
 0x100   :  { %875 = vmatmul.mubr.msk.f32.vlgmr.msra.gmra.mrb[4].mxu0 %vm38_vm1, %v25_v48 }
 0x101   :  { %890 = vmatprep.mubr.msk.f32.mxu0 %vm990_vm0, %v991_v1 }
 0x1cb   :  { %v267_v53 = vpop.f32.mrb[2].mxu0 }
 0x1cc   :  { %v268_v54 = vadd.f32 %v267_v53, %v196_v51  ;;  %v843_v55 = vpop.f32.mrb[3].mxu0 }
 0x1ce   :  { %v274_v58 = vrot.slane %v268_v54, %v273_v52 }
 0x1d0   :  { %v275_v60 = vadd.f32 %v274_v58, %v25_v48 }
 0x1d2   :  { %853 = vmatmul.mubr.msk.f32.vlgmr.msra.gmra.mrb[2].mxu1 %vm38_vm1, %v275_v60 }
 0x1d3   :  { %930 = vmatpush3.bf16.msra.mxu1 %v929_v59  ;;  %863 = vmatprep.mubr.msk.f32.mxu1 %vm990_vm0, %v991_v1  ;;  %v503_v9 = vpop.f32.mrb[4].mxu0 }
 0x1d4   :  { %931 = vmatprep.subr.bf16.mxu1 %v989_v0  ;;  %v876_v10 = vpop.f32.mrb[5].mxu0 }
 0x1d7   :  { %933 = vmatpush3.bf16.msra.mxu1 %v932_v63 }
 0x1d8   :  { %940 = vmatprep.subr.bf16.mxu1 %v989_v0 }
 0x1da   :  { %864 = vmatmul.mubr.msk.f32.vlgmr.msra.gmra.mrb[2].mxu1 %vm38_vm1, %v25_v48 }
 0x1db   :  { %942 = vmatpush3.bf16.msra.mxu1 %v941_v4  ;;  %885 = vmatprep.mubr.msk.f32.mxu1 %vm990_vm0, %v991_v1 }
 0x1dc   :  { %943 = vmatprep.subr.bf16.mxu1 %v989_v0  ;;  %v504_v0 = vadd.f32 %v503_v9, %v436_v12 }
 0x1df   :  { %945 = vmatpush3.bf16.msra.mxu1 %v944_v7 }
 0x1e0   :  { %893 = vmatprep.subr.mxu1 %v991_v1 }
 0x1e2   :  { %886 = vmatmul.mubr.msk.f32.vlgmr.msra.gmra.mrb[4].mxu1 %vm38_vm1, %v26_v8 }
 0x1e3   :  { %895 = vmatprep.mubr.msk.f32.mxu1 %vm990_vm0, %v991_v1  ;;  %894 = vmatpush3.msra.mxu1 %v27_v23 }
 0x2b5   :  { %v581_v13 = vpop.f32.mrb[4].mxu1 }
 0x2b6   :  { %v582_v14 = vadd.f32 %v581_v13, %v511_v11  ;;  %v887_v15 = vpop.f32.mrb[5].mxu1 }
 0x2b8   :  { %889 = vmatpush3.xpose.msra.mxu0 %v582_v14 }
 0x2bb   :  { %891 = vmatmul.mubr.f32.vlgmr.msra.gmra.mrb[6].mxu0 %v504_v0 }
 0x38e   :  { %v651_v16 = vpop.f32.mrb[6].mxu0 }
 0x38f   :  { %v892_v17 = vpop.f32.mrb[7].mxu0  ;;  %v656_v18 = vsel %vm655_vm3, %v651_v16, -inf }
 0x390   :  { %657 = vmax.xlane.f32.xlu0 %v656_v18 }
 0x41d   :  { %v658_v19 = vpop.xlane.xlu0 %657 }
 0x41e   :  { %v659_v20 = vsub.f32 %v651_v16, %v658_v19 }
 0x420   :  { %v660_v21 = vmul.f32 1.442695, %v659_v20 }
 0x422   :  { %958 = vpow2.f32 %v660_v21 }
 0x42c   :  { %v959_v1 = vpop.eup %958 }
 0x42d   :  { %v662_v22 = vsel %vm655_vm3, %v959_v1, 0.0 }
 0x42e   :  { %663 = vadd.xlane.f32.xlu0 %v662_v22 }
 0x4bb   :  { %v664_v24 = vpop.xlane.xlu0 %663 }
 0x4bc   :  { %960 = vrcp.f32 %v664_v24 }
 0x4c6   :  { %v961_v25 = vpop.eup %960 }
 0x4c7   :  { %v666_v26 = vmul.f32 %v961_v25, %v959_v1 }
 0x4c9   :  { %742 = vrot.lane.b32.xlu1 %v666_v26, %s992_s4  ;;  %896 = vmatmul.mubr.msk.f32.vlgmr.msra.gmra.mrb[2].mxu1 %vm655_vm3, %v666_v26 }
 0x53b   :  { %v743_v31 = vpop.permute.xlu1 %742 }
 0x59c   :  { %v736_v28 = vpop.f32.mrb[2].mxu1 }
 0x59d   :  { %v946_v29 = vadd.f32 %v736_v28, %v430_v27  ;;  %v897_v30 = vpop.f32.mrb[3].mxu1 }
 0x59f   :  { %741 = vst.msk [vmem:[%s1089_s2] sm:$0xff] %vm38_vm1, %v946_v29 }
 0x5a0   :  { %746 = vst.msk [vmem:[%s1089_s2] sm:$0xff] %vm745_vm4, %v743_v31 }
 0x5a1   :  { %751 = vsyncpa [#allocation3], 1 }

</bundles_post_ra>
